<compile_context>
chip_gen: v6e
topology: v6e:2x2x1
jax: 0.10.0
libtpu: 0.0.40
codegen_flags: <defaults>
</compile_context>

<pallas_src>
import math
import functools

import jax
import jax.numpy as jnp
from jax.experimental import pallas as pl
from jax.experimental.pallas import tpu as pltpu

GRID_SIZE = 5
SPLINE_ORDER = 3


def _round_up(v, m):
    return (v + m - 1) // m * m


def _grid_knots(grid_size, spline_order):
    # grid_values = arange(-k, G+k+1) * (2/G) - 1 ; same for every input feature.
    step = 2.0 / grid_size
    return [float(j) * step - 1.0
            for j in range(-spline_order, grid_size + spline_order + 1)]


# ----------------------------- kernel -----------------------------

def _kan_kernel(x_ref, w_ref, o_ref, *, grid_size, spline_order):
    """One (TB, TN) output tile.

    x_ref : (TB, IN)            f32
    w_ref : ((n_coeff+1)*IN, TN) compute dtype (f32 or bf16), packed as
            [ base_weight.T ; W_spline[coeff 0] ; ... ; W_spline[coeff n-1] ]
    o_ref : (TB, TN)            f32
    """
    x = x_ref[...]
    knots = _grid_knots(grid_size, spline_order)     # compile-time constants
    num_knots = len(knots)

    # ---- SiLU (elementwise stays f32; exp/logistic land on the EUP slot) ----
    silu = x * jax.nn.sigmoid(x)

    # ---- B-spline bases via Cox-de Boor (VPU, fully unrolled) ----
    # One `x >= knot` compare per knot; since knots are strictly increasing,
    # the order-0 interval indicator (x >= k[j]) & (x < k[j+1]) is exactly
    # ge[j] - ge[j+1] (keeps the strict '<' at the right edge, as in PyTorch).
    ge = [(x >= k).astype(jnp.float32) for k in knots]
    bases = [ge[j] - ge[j + 1] for j in range(num_knots - 1)]

    for order in range(1, spline_order + 1):
        new_bases = []
        for j in range(len(bases) - 1):
            inv_l = 1.0 / (knots[j + order] - knots[j])          # constants
            inv_r = 1.0 / (knots[j + order + 1] - knots[j + 1])  # folded at trace time
            left = (x - knots[j]) * inv_l * bases[j]
            right = (knots[j + order + 1] - x) * inv_r * bases[j + 1]
            new_bases.append(left + right)
        bases = new_bases
    # len(bases) == grid_size + spline_order == n_coeff

    # ---- single fused MXU matmul: (TB, (n_coeff+1)*IN) x (K, TN) ----
    slab = jnp.concatenate([silu] + bases, axis=-1).astype(w_ref.dtype)
    o_ref[...] = jnp.dot(
        slab, w_ref[...], preferred_element_type=jnp.float32
    ).astype(o_ref.dtype)


# ----------------------------- wrapper -----------------------------

def pack_kan_weights(base_weight, spline_weight, *, dtype=jnp.float32,
                     grid_size=GRID_SIZE, spline_order=SPLINE_ORDER):
    """Pack base_weight (OUT, IN) and spline_weight (OUT, IN, n_coeff) into a
    single ((n_coeff+1)*IN, OUT_pad) matrix matching the kernel's slab layout.
    Call ONCE per layer (outside the hot path); OUT is zero-padded to a
    multiple of 128 so output stores are lane-dense."""
    OUT, IN = base_weight.shape
    n_coeff = grid_size + spline_order
    bw = jnp.asarray(base_weight, jnp.float32).T                            # (IN, OUT)
    sw = jnp.transpose(jnp.asarray(spline_weight, jnp.float32), (2, 1, 0))  # (n_coeff, IN, OUT)
    sw = sw.reshape(n_coeff * IN, OUT)
    w = jnp.concatenate([bw, sw], axis=0)                                   # (K, OUT)
    out_pad = _round_up(OUT, 128)
    if out_pad > OUT:
        w = jnp.pad(w, ((0, 0), (0, out_pad - OUT)))
    return w.astype(dtype)


def _pick_block_n(out_pad, K, block_b, itemsize, budget=40 << 20):
    bn = min(_round_up(out_pad, 128), 512)
    while bn > 128:
        vmem = (2 * K * bn * itemsize          # double-buffered weight tile
                + 2 * block_b * bn * 4         # output tile
                + 2 * block_b * K * 4)         # slab + x (f32)
        if out_pad % bn == 0 and vmem <= budget:
            break
        bn -= 128
    return max(bn, 128)


def kan_linear(x, w_packed, out_features, *,
               grid_size=GRID_SIZE, spline_order=SPLINE_ORDER,
               block_b=None, block_n=None):
    """x: (B, IN) f32; w_packed: output of pack_kan_weights; returns (B, OUT)."""
    B, IN = x.shape
    n_coeff = grid_size + spline_order
    K = (n_coeff + 1) * IN
    assert w_packed.shape[0] == K
    OUT_pad = w_packed.shape[1]
    assert OUT_pad % 128 == 0 and OUT_pad >= out_features

    # --- tile selection (batch multiple of 8, out multiple of 128) ---
    B_pad = _round_up(max(B, 8), 8)
    if block_b is None:
        block_b = min(B_pad, 256)
    block_b = min(_round_up(block_b, 8), B_pad)
    B_pad = _round_up(B_pad, block_b)
    if block_n is None:
        block_n = _pick_block_n(OUT_pad, K, block_b,
                                jnp.dtype(w_packed.dtype).itemsize)
    assert OUT_pad % block_n == 0 and block_n % 128 == 0

    x_f32 = jnp.asarray(x, jnp.float32)
    if B_pad > B:
        x_f32 = jnp.pad(x_f32, ((0, B_pad - B), (0, 0)))

    kernel = functools.partial(_kan_kernel, grid_size=grid_size,
                               spline_order=spline_order)

    out = pl.pallas_call(
        kernel,
        out_shape=jax.ShapeDtypeStruct((B_pad, OUT_pad), jnp.float32),
        grid_spec=pltpu.PrefetchScalarGridSpec(
            num_scalar_prefetch=0,
            grid=(B_pad // block_b, OUT_pad // block_n),
            in_specs=[
                pl.BlockSpec((block_b, IN), lambda i, j: (i, 0)),
                pl.BlockSpec((K, block_n), lambda i, j: (0, j)),
            ],
            out_specs=pl.BlockSpec((block_b, block_n), lambda i, j: (i, j)),
        ),
        compiler_params=pltpu.CompilerParams(
            dimension_semantics=("parallel", "parallel"),
            vmem_limit_bytes=48 * 1024 * 1024,
        ),
    )(x_f32, w_packed)

    return out[:B, :out_features]


# ---------------- pure-JAX reference (mirrors the PyTorch code) ----------------

def _b_splines_ref(x, grid_size, spline_order):
    knots = jnp.asarray(_grid_knots(grid_size, spline_order), jnp.float32)  # (L,)
    B, IN = x.shape
    g = jnp.broadcast_to(knots[None, None, :], (B, IN, knots.shape[0]))
    xe = x[..., None]
    bases = ((xe >= g[:, :, :-1]) & (xe < g[:, :, 1:])).astype(x.dtype)
    for order in range(1, spline_order + 1):
        left = (xe - g[:, :, : -order - 1]) / (
            g[:, :, order:-1] - g[:, :, : -order - 1]
        ) * bases[:, :, :-1]
        right = (g[:, :, order + 1:] - xe) / (
            g[:, :, order + 1:] - g[:, :, 1:-order]
        ) * bases[:, :, 1:]
        bases = left + right
    return bases  # (B, IN, n_coeff)


def kan_linear_ref(x, base_weight, spline_weight,
                   grid_size=GRID_SIZE, spline_order=SPLINE_ORDER):
    B = x.shape[0]
    OUT = base_weight.shape[0]
    base_out = jax.nn.silu(x) @ base_weight.T
    bases = _b_splines_ref(x, grid_size, spline_order).reshape(B, -1)
    spline_out = bases @ spline_weight.reshape(OUT, -1).T
    return base_out + spline_out


if __name__ == "__main__":
    BATCH = 8
    IN_FEATURES = 32
    OUT_FEATURES = 64
    N_COEFF = GRID_SIZE + SPLINE_ORDER

    key = jax.random.PRNGKey(0)
    kx, kb, ks = jax.random.split(key, 3)

    # Deterministic parameter init (shapes from the module's __init__).
    # base_weight: kaiming_uniform(a=sqrt(5)) -> U(-1/sqrt(fan_in), 1/sqrt(fan_in)).
    bound = 1.0 / math.sqrt(IN_FEATURES)
    base_weight = jax.random.uniform(
        kb, (OUT_FEATURES, IN_FEATURES), jnp.float32, minval=-bound, maxval=bound
    )
    # TODO(synk): lstsq-based curve2coeff spline_weight init not reproduced
    # (init-only; the forward pass is unaffected). Small uniform coeffs instead.
    spline_weight = jax.random.uniform(
        ks, (OUT_FEATURES, IN_FEATURES, N_COEFF), jnp.float32,
        minval=-0.05, maxval=0.05,
    )
    x = jax.random.uniform(
        kx, (BATCH, IN_FEATURES), jnp.float32, minval=-1.0, maxval=1.0
    )

    ref = jax.block_until_ready(kan_linear_ref(x, base_weight, spline_weight))

    # f32 path: exact semantics match (1e-5).
    w_f32 = pack_kan_weights(base_weight, spline_weight, dtype=jnp.float32)
    out_f32 = jax.block_until_ready(kan_linear(x, w_f32, OUT_FEATURES))
    assert out_f32.shape == (BATCH, OUT_FEATURES)
    assert jnp.allclose(out_f32, ref, rtol=1e-5, atol=1e-5), (
        f"f32 max abs diff = {jnp.max(jnp.abs(out_f32 - ref))}"
    )

    # bf16-weight path (halves weight HBM traffic / VMEM; f32 accumulation kept).
    w_bf16 = pack_kan_weights(base_weight, spline_weight, dtype=jnp.bfloat16)
    out_bf16 = jax.block_until_ready(kan_linear(x, w_bf16, OUT_FEATURES))
    assert jnp.allclose(out_bf16, ref, rtol=3e-2, atol=3e-2), (
        f"bf16 max abs diff = {jnp.max(jnp.abs(out_bf16 - ref))}"
    )

    print("KERNEL_OK")
</pallas_src>

<mosaic_0001>
module attributes {stable_mosaic.version = 11 : i64} {
  func.func @_kan_kernel(%arg0: i32, %arg1: i32, %arg2: memref<8x32xf32, #tpu.memory_space<vmem>>, %arg3: memref<288x128xf32, #tpu.memory_space<vmem>>, %arg4: memref<8x128xf32, #tpu.memory_space<vmem>>) attributes {dimension_semantics = [#tpu.dimension_semantics<parallel>, #tpu.dimension_semantics<parallel>], iteration_bounds = array<i64: 1, 1>, scalar_prefetch = 0 : i64, scratch_operands = 0 : i64, tpu.core_type = #tpu.core_type<tc>, window_params = [{transform_indices = @transform_0, window_bounds = array<i64: 8, 32>}, {transform_indices = @transform_1, window_bounds = array<i64: 288, 128>}, {transform_indices = @transform_2, window_bounds = array<i64: 8, 128>}]} {
    %c0 = arith.constant 0 : index
    %c0_0 = arith.constant 0 : index
    %0 = vector.load %arg2[%c0, %c0_0] : memref<8x32xf32, #tpu.memory_space<vmem>>, vector<8x32xf32>
    %1 = arith.negf %0 : vector<8x32xf32>
    %2 = math.exp %1 : vector<8x32xf32>
    %cst = arith.constant 1.000000e+00 : f32
    %3 = vector.broadcast %cst : f32 to vector<8x32xf32>
    %4 = arith.addf %3, %2 : vector<8x32xf32>
    %5 = arith.divf %3, %4 : vector<8x32xf32>
    %6 = arith.mulf %0, %5 : vector<8x32xf32>
    %cst_1 = arith.constant -2.200000e+00 : f32
    %7 = vector.broadcast %cst_1 : f32 to vector<8x32xf32>
    %8 = arith.cmpf oge, %0, %7 : vector<8x32xf32>
    %9 = arith.extui %8 : vector<8x32xi1> to vector<8x32xi32>
    %10 = arith.sitofp %9 : vector<8x32xi32> to vector<8x32xf32>
    %cst_2 = arith.constant -1.800000e+00 : f32
    %11 = vector.broadcast %cst_2 : f32 to vector<8x32xf32>
    %12 = arith.cmpf oge, %0, %11 : vector<8x32xf32>
    %13 = arith.extui %12 : vector<8x32xi1> to vector<8x32xi32>
    %14 = arith.sitofp %13 : vector<8x32xi32> to vector<8x32xf32>
    %cst_3 = arith.constant -1.400000e+00 : f32
    %15 = vector.broadcast %cst_3 : f32 to vector<8x32xf32>
    %16 = arith.cmpf oge, %0, %15 : vector<8x32xf32>
    %17 = arith.extui %16 : vector<8x32xi1> to vector<8x32xi32>
    %18 = arith.sitofp %17 : vector<8x32xi32> to vector<8x32xf32>
    %cst_4 = arith.constant -1.000000e+00 : f32
    %19 = vector.broadcast %cst_4 : f32 to vector<8x32xf32>
    %20 = arith.cmpf oge, %0, %19 : vector<8x32xf32>
    %21 = arith.extui %20 : vector<8x32xi1> to vector<8x32xi32>
    %22 = arith.sitofp %21 : vector<8x32xi32> to vector<8x32xf32>
    %cst_5 = arith.constant -6.000000e-01 : f32
    %23 = vector.broadcast %cst_5 : f32 to vector<8x32xf32>
    %24 = arith.cmpf oge, %0, %23 : vector<8x32xf32>
    %25 = arith.extui %24 : vector<8x32xi1> to vector<8x32xi32>
    %26 = arith.sitofp %25 : vector<8x32xi32> to vector<8x32xf32>
    %cst_6 = arith.constant -2.000000e-01 : f32
    %27 = vector.broadcast %cst_6 : f32 to vector<8x32xf32>
    %28 = arith.cmpf oge, %0, %27 : vector<8x32xf32>
    %29 = arith.extui %28 : vector<8x32xi1> to vector<8x32xi32>
    %30 = arith.sitofp %29 : vector<8x32xi32> to vector<8x32xf32>
    %cst_7 = arith.constant 2.000000e-01 : f32
    %31 = vector.broadcast %cst_7 : f32 to vector<8x32xf32>
    %32 = arith.cmpf oge, %0, %31 : vector<8x32xf32>
    %33 = arith.extui %32 : vector<8x32xi1> to vector<8x32xi32>
    %34 = arith.sitofp %33 : vector<8x32xi32> to vector<8x32xf32>
    %cst_8 = arith.constant 6.000000e-01 : f32
    %35 = vector.broadcast %cst_8 : f32 to vector<8x32xf32>
    %36 = arith.cmpf oge, %0, %35 : vector<8x32xf32>
    %37 = arith.extui %36 : vector<8x32xi1> to vector<8x32xi32>
    %38 = arith.sitofp %37 : vector<8x32xi32> to vector<8x32xf32>
    %cst_9 = arith.constant 1.000000e+00 : f32
    %39 = vector.broadcast %cst_9 : f32 to vector<8x32xf32>
    %40 = arith.cmpf oge, %0, %39 : vector<8x32xf32>
    %41 = arith.extui %40 : vector<8x32xi1> to vector<8x32xi32>
    %42 = arith.sitofp %41 : vector<8x32xi32> to vector<8x32xf32>
    %cst_10 = arith.constant 1.400000e+00 : f32
    %43 = vector.broadcast %cst_10 : f32 to vector<8x32xf32>
    %44 = arith.cmpf oge, %0, %43 : vector<8x32xf32>
    %45 = arith.extui %44 : vector<8x32xi1> to vector<8x32xi32>
    %46 = arith.sitofp %45 : vector<8x32xi32> to vector<8x32xf32>
    %cst_11 = arith.constant 1.800000e+00 : f32
    %47 = vector.broadcast %cst_11 : f32 to vector<8x32xf32>
    %48 = arith.cmpf oge, %0, %47 : vector<8x32xf32>
    %49 = arith.extui %48 : vector<8x32xi1> to vector<8x32xi32>
    %50 = arith.sitofp %49 : vector<8x32xi32> to vector<8x32xf32>
    %cst_12 = arith.constant 2.200000e+00 : f32
    %51 = vector.broadcast %cst_12 : f32 to vector<8x32xf32>
    %52 = arith.cmpf oge, %0, %51 : vector<8x32xf32>
    %53 = arith.extui %52 : vector<8x32xi1> to vector<8x32xi32>
    %54 = arith.sitofp %53 : vector<8x32xi32> to vector<8x32xf32>
    %55 = arith.subf %10, %14 : vector<8x32xf32>
    %56 = arith.subf %14, %18 : vector<8x32xf32>
    %57 = arith.subf %18, %22 : vector<8x32xf32>
    %58 = arith.subf %22, %26 : vector<8x32xf32>
    %59 = arith.subf %26, %30 : vector<8x32xf32>
    %60 = arith.subf %30, %34 : vector<8x32xf32>
    %61 = arith.subf %34, %38 : vector<8x32xf32>
    %62 = arith.subf %38, %42 : vector<8x32xf32>
    %63 = arith.subf %42, %46 : vector<8x32xf32>
    %64 = arith.subf %46, %50 : vector<8x32xf32>
    %65 = arith.subf %50, %54 : vector<8x32xf32>
    %cst_13 = arith.constant -2.200000e+00 : f32
    %66 = vector.broadcast %cst_13 : f32 to vector<8x32xf32>
    %67 = arith.subf %0, %66 : vector<8x32xf32>
    %cst_14 = arith.constant 2.500000e+00 : f32
    %68 = vector.broadcast %cst_14 : f32 to vector<8x32xf32>
    %69 = arith.mulf %67, %68 : vector<8x32xf32>
    %70 = arith.mulf %69, %55 : vector<8x32xf32>
    %cst_15 = arith.constant -1.400000e+00 : f32
    %71 = vector.broadcast %cst_15 : f32 to vector<8x32xf32>
    %72 = arith.subf %71, %0 : vector<8x32xf32>
    %cst_16 = arith.constant 2.500000e+00 : f32
    %73 = vector.broadcast %cst_16 : f32 to vector<8x32xf32>
    %74 = arith.mulf %72, %73 : vector<8x32xf32>
    %75 = arith.mulf %74, %56 : vector<8x32xf32>
    %76 = arith.addf %70, %75 : vector<8x32xf32>
    %cst_17 = arith.constant -1.800000e+00 : f32
    %77 = vector.broadcast %cst_17 : f32 to vector<8x32xf32>
    %78 = arith.subf %0, %77 : vector<8x32xf32>
    %cst_18 = arith.constant 2.500000e+00 : f32
    %79 = vector.broadcast %cst_18 : f32 to vector<8x32xf32>
    %80 = arith.mulf %78, %79 : vector<8x32xf32>
    %81 = arith.mulf %80, %56 : vector<8x32xf32>
    %cst_19 = arith.constant -1.000000e+00 : f32
    %82 = vector.broadcast %cst_19 : f32 to vector<8x32xf32>
    %83 = arith.subf %82, %0 : vector<8x32xf32>
    %cst_20 = arith.constant 2.500000e+00 : f32
    %84 = vector.broadcast %cst_20 : f32 to vector<8x32xf32>
    %85 = arith.mulf %83, %84 : vector<8x32xf32>
    %86 = arith.mulf %85, %57 : vector<8x32xf32>
    %87 = arith.addf %81, %86 : vector<8x32xf32>
    %cst_21 = arith.constant -1.400000e+00 : f32
    %88 = vector.broadcast %cst_21 : f32 to vector<8x32xf32>
    %89 = arith.subf %0, %88 : vector<8x32xf32>
    %cst_22 = arith.constant 2.500000e+00 : f32
    %90 = vector.broadcast %cst_22 : f32 to vector<8x32xf32>
    %91 = arith.mulf %89, %90 : vector<8x32xf32>
    %92 = arith.mulf %91, %57 : vector<8x32xf32>
    %cst_23 = arith.constant -6.000000e-01 : f32
    %93 = vector.broadcast %cst_23 : f32 to vector<8x32xf32>
    %94 = arith.subf %93, %0 : vector<8x32xf32>
    %cst_24 = arith.constant 2.500000e+00 : f32
    %95 = vector.broadcast %cst_24 : f32 to vector<8x32xf32>
    %96 = arith.mulf %94, %95 : vector<8x32xf32>
    %97 = arith.mulf %96, %58 : vector<8x32xf32>
    %98 = arith.addf %92, %97 : vector<8x32xf32>
    %cst_25 = arith.constant -1.000000e+00 : f32
    %99 = vector.broadcast %cst_25 : f32 to vector<8x32xf32>
    %100 = arith.subf %0, %99 : vector<8x32xf32>
    %cst_26 = arith.constant 2.500000e+00 : f32
    %101 = vector.broadcast %cst_26 : f32 to vector<8x32xf32>
    %102 = arith.mulf %100, %101 : vector<8x32xf32>
    %103 = arith.mulf %102, %58 : vector<8x32xf32>
    %cst_27 = arith.constant -2.000000e-01 : f32
    %104 = vector.broadcast %cst_27 : f32 to vector<8x32xf32>
    %105 = arith.subf %104, %0 : vector<8x32xf32>
    %cst_28 = arith.constant 2.500000e+00 : f32
    %106 = vector.broadcast %cst_28 : f32 to vector<8x32xf32>
    %107 = arith.mulf %105, %106 : vector<8x32xf32>
    %108 = arith.mulf %107, %59 : vector<8x32xf32>
    %109 = arith.addf %103, %108 : vector<8x32xf32>
    %cst_29 = arith.constant -6.000000e-01 : f32
    %110 = vector.broadcast %cst_29 : f32 to vector<8x32xf32>
    %111 = arith.subf %0, %110 : vector<8x32xf32>
    %cst_30 = arith.constant 2.500000e+00 : f32
    %112 = vector.broadcast %cst_30 : f32 to vector<8x32xf32>
    %113 = arith.mulf %111, %112 : vector<8x32xf32>
    %114 = arith.mulf %113, %59 : vector<8x32xf32>
    %cst_31 = arith.constant 2.000000e-01 : f32
    %115 = vector.broadcast %cst_31 : f32 to vector<8x32xf32>
    %116 = arith.subf %115, %0 : vector<8x32xf32>
    %cst_32 = arith.constant 2.500000e+00 : f32
    %117 = vector.broadcast %cst_32 : f32 to vector<8x32xf32>
    %118 = arith.mulf %116, %117 : vector<8x32xf32>
    %119 = arith.mulf %118, %60 : vector<8x32xf32>
    %120 = arith.addf %114, %119 : vector<8x32xf32>
    %cst_33 = arith.constant -2.000000e-01 : f32
    %121 = vector.broadcast %cst_33 : f32 to vector<8x32xf32>
    %122 = arith.subf %0, %121 : vector<8x32xf32>
    %cst_34 = arith.constant 2.500000e+00 : f32
    %123 = vector.broadcast %cst_34 : f32 to vector<8x32xf32>
    %124 = arith.mulf %122, %123 : vector<8x32xf32>
    %125 = arith.mulf %124, %60 : vector<8x32xf32>
    %cst_35 = arith.constant 6.000000e-01 : f32
    %126 = vector.broadcast %cst_35 : f32 to vector<8x32xf32>
    %127 = arith.subf %126, %0 : vector<8x32xf32>
    %cst_36 = arith.constant 2.500000e+00 : f32
    %128 = vector.broadcast %cst_36 : f32 to vector<8x32xf32>
    %129 = arith.mulf %127, %128 : vector<8x32xf32>
    %130 = arith.mulf %129, %61 : vector<8x32xf32>
    %131 = arith.addf %125, %130 : vector<8x32xf32>
    %cst_37 = arith.constant 2.000000e-01 : f32
    %132 = vector.broadcast %cst_37 : f32 to vector<8x32xf32>
    %133 = arith.subf %0, %132 : vector<8x32xf32>
    %cst_38 = arith.constant 2.500000e+00 : f32
    %134 = vector.broadcast %cst_38 : f32 to vector<8x32xf32>
    %135 = arith.mulf %133, %134 : vector<8x32xf32>
    %136 = arith.mulf %135, %61 : vector<8x32xf32>
    %cst_39 = arith.constant 1.000000e+00 : f32
    %137 = vector.broadcast %cst_39 : f32 to vector<8x32xf32>
    %138 = arith.subf %137, %0 : vector<8x32xf32>
    %cst_40 = arith.constant 2.500000e+00 : f32
    %139 = vector.broadcast %cst_40 : f32 to vector<8x32xf32>
    %140 = arith.mulf %138, %139 : vector<8x32xf32>
    %141 = arith.mulf %140, %62 : vector<8x32xf32>
    %142 = arith.addf %136, %141 : vector<8x32xf32>
    %cst_41 = arith.constant 6.000000e-01 : f32
    %143 = vector.broadcast %cst_41 : f32 to vector<8x32xf32>
    %144 = arith.subf %0, %143 : vector<8x32xf32>
    %cst_42 = arith.constant 2.500000e+00 : f32
    %145 = vector.broadcast %cst_42 : f32 to vector<8x32xf32>
    %146 = arith.mulf %144, %145 : vector<8x32xf32>
    %147 = arith.mulf %146, %62 : vector<8x32xf32>
    %cst_43 = arith.constant 1.400000e+00 : f32
    %148 = vector.broadcast %cst_43 : f32 to vector<8x32xf32>
    %149 = arith.subf %148, %0 : vector<8x32xf32>
    %cst_44 = arith.constant 2.500000e+00 : f32
    %150 = vector.broadcast %cst_44 : f32 to vector<8x32xf32>
    %151 = arith.mulf %149, %150 : vector<8x32xf32>
    %152 = arith.mulf %151, %63 : vector<8x32xf32>
    %153 = arith.addf %147, %152 : vector<8x32xf32>
    %cst_45 = arith.constant 1.000000e+00 : f32
    %154 = vector.broadcast %cst_45 : f32 to vector<8x32xf32>
    %155 = arith.subf %0, %154 : vector<8x32xf32>
    %cst_46 = arith.constant 2.500000e+00 : f32
    %156 = vector.broadcast %cst_46 : f32 to vector<8x32xf32>
    %157 = arith.mulf %155, %156 : vector<8x32xf32>
    %158 = arith.mulf %157, %63 : vector<8x32xf32>
    %cst_47 = arith.constant 1.800000e+00 : f32
    %159 = vector.broadcast %cst_47 : f32 to vector<8x32xf32>
    %160 = arith.subf %159, %0 : vector<8x32xf32>
    %cst_48 = arith.constant 2.500000e+00 : f32
    %161 = vector.broadcast %cst_48 : f32 to vector<8x32xf32>
    %162 = arith.mulf %160, %161 : vector<8x32xf32>
    %163 = arith.mulf %162, %64 : vector<8x32xf32>
    %164 = arith.addf %158, %163 : vector<8x32xf32>
    %cst_49 = arith.constant 1.400000e+00 : f32
    %165 = vector.broadcast %cst_49 : f32 to vector<8x32xf32>
    %166 = arith.subf %0, %165 : vector<8x32xf32>
    %cst_50 = arith.constant 2.500000e+00 : f32
    %167 = vector.broadcast %cst_50 : f32 to vector<8x32xf32>
    %168 = arith.mulf %166, %167 : vector<8x32xf32>
    %169 = arith.mulf %168, %64 : vector<8x32xf32>
    %cst_51 = arith.constant 2.200000e+00 : f32
    %170 = vector.broadcast %cst_51 : f32 to vector<8x32xf32>
    %171 = arith.subf %170, %0 : vector<8x32xf32>
    %cst_52 = arith.constant 2.500000e+00 : f32
    %172 = vector.broadcast %cst_52 : f32 to vector<8x32xf32>
    %173 = arith.mulf %171, %172 : vector<8x32xf32>
    %174 = arith.mulf %173, %65 : vector<8x32xf32>
    %175 = arith.addf %169, %174 : vector<8x32xf32>
    %cst_53 = arith.constant -2.200000e+00 : f32
    %176 = vector.broadcast %cst_53 : f32 to vector<8x32xf32>
    %177 = arith.subf %0, %176 : vector<8x32xf32>
    %cst_54 = arith.constant 1.250000e+00 : f32
    %178 = vector.broadcast %cst_54 : f32 to vector<8x32xf32>
    %179 = arith.mulf %177, %178 : vector<8x32xf32>
    %180 = arith.mulf %179, %76 : vector<8x32xf32>
    %cst_55 = arith.constant -1.000000e+00 : f32
    %181 = vector.broadcast %cst_55 : f32 to vector<8x32xf32>
    %182 = arith.subf %181, %0 : vector<8x32xf32>
    %cst_56 = arith.constant 1.250000e+00 : f32
    %183 = vector.broadcast %cst_56 : f32 to vector<8x32xf32>
    %184 = arith.mulf %182, %183 : vector<8x32xf32>
    %185 = arith.mulf %184, %87 : vector<8x32xf32>
    %186 = arith.addf %180, %185 : vector<8x32xf32>
    %cst_57 = arith.constant -1.800000e+00 : f32
    %187 = vector.broadcast %cst_57 : f32 to vector<8x32xf32>
    %188 = arith.subf %0, %187 : vector<8x32xf32>
    %cst_58 = arith.constant 1.250000e+00 : f32
    %189 = vector.broadcast %cst_58 : f32 to vector<8x32xf32>
    %190 = arith.mulf %188, %189 : vector<8x32xf32>
    %191 = arith.mulf %190, %87 : vector<8x32xf32>
    %cst_59 = arith.constant -6.000000e-01 : f32
    %192 = vector.broadcast %cst_59 : f32 to vector<8x32xf32>
    %193 = arith.subf %192, %0 : vector<8x32xf32>
    %cst_60 = arith.constant 1.250000e+00 : f32
    %194 = vector.broadcast %cst_60 : f32 to vector<8x32xf32>
    %195 = arith.mulf %193, %194 : vector<8x32xf32>
    %196 = arith.mulf %195, %98 : vector<8x32xf32>
    %197 = arith.addf %191, %196 : vector<8x32xf32>
    %cst_61 = arith.constant -1.400000e+00 : f32
    %198 = vector.broadcast %cst_61 : f32 to vector<8x32xf32>
    %199 = arith.subf %0, %198 : vector<8x32xf32>
    %cst_62 = arith.constant 1.250000e+00 : f32
    %200 = vector.broadcast %cst_62 : f32 to vector<8x32xf32>
    %201 = arith.mulf %199, %200 : vector<8x32xf32>
    %202 = arith.mulf %201, %98 : vector<8x32xf32>
    %cst_63 = arith.constant -2.000000e-01 : f32
    %203 = vector.broadcast %cst_63 : f32 to vector<8x32xf32>
    %204 = arith.subf %203, %0 : vector<8x32xf32>
    %cst_64 = arith.constant 1.250000e+00 : f32
    %205 = vector.broadcast %cst_64 : f32 to vector<8x32xf32>
    %206 = arith.mulf %204, %205 : vector<8x32xf32>
    %207 = arith.mulf %206, %109 : vector<8x32xf32>
    %208 = arith.addf %202, %207 : vector<8x32xf32>
    %cst_65 = arith.constant -1.000000e+00 : f32
    %209 = vector.broadcast %cst_65 : f32 to vector<8x32xf32>
    %210 = arith.subf %0, %209 : vector<8x32xf32>
    %cst_66 = arith.constant 1.250000e+00 : f32
    %211 = vector.broadcast %cst_66 : f32 to vector<8x32xf32>
    %212 = arith.mulf %210, %211 : vector<8x32xf32>
    %213 = arith.mulf %212, %109 : vector<8x32xf32>
    %cst_67 = arith.constant 2.000000e-01 : f32
    %214 = vector.broadcast %cst_67 : f32 to vector<8x32xf32>
    %215 = arith.subf %214, %0 : vector<8x32xf32>
    %cst_68 = arith.constant 1.250000e+00 : f32
    %216 = vector.broadcast %cst_68 : f32 to vector<8x32xf32>
    %217 = arith.mulf %215, %216 : vector<8x32xf32>
    %218 = arith.mulf %217, %120 : vector<8x32xf32>
    %219 = arith.addf %213, %218 : vector<8x32xf32>
    %cst_69 = arith.constant -6.000000e-01 : f32
    %220 = vector.broadcast %cst_69 : f32 to vector<8x32xf32>
    %221 = arith.subf %0, %220 : vector<8x32xf32>
    %cst_70 = arith.constant 1.250000e+00 : f32
    %222 = vector.broadcast %cst_70 : f32 to vector<8x32xf32>
    %223 = arith.mulf %221, %222 : vector<8x32xf32>
    %224 = arith.mulf %223, %120 : vector<8x32xf32>
    %cst_71 = arith.constant 6.000000e-01 : f32
    %225 = vector.broadcast %cst_71 : f32 to vector<8x32xf32>
    %226 = arith.subf %225, %0 : vector<8x32xf32>
    %cst_72 = arith.constant 1.250000e+00 : f32
    %227 = vector.broadcast %cst_72 : f32 to vector<8x32xf32>
    %228 = arith.mulf %226, %227 : vector<8x32xf32>
    %229 = arith.mulf %228, %131 : vector<8x32xf32>
    %230 = arith.addf %224, %229 : vector<8x32xf32>
    %cst_73 = arith.constant -2.000000e-01 : f32
    %231 = vector.broadcast %cst_73 : f32 to vector<8x32xf32>
    %232 = arith.subf %0, %231 : vector<8x32xf32>
    %cst_74 = arith.constant 1.250000e+00 : f32
    %233 = vector.broadcast %cst_74 : f32 to vector<8x32xf32>
    %234 = arith.mulf %232, %233 : vector<8x32xf32>
    %235 = arith.mulf %234, %131 : vector<8x32xf32>
    %cst_75 = arith.constant 1.000000e+00 : f32
    %236 = vector.broadcast %cst_75 : f32 to vector<8x32xf32>
    %237 = arith.subf %236, %0 : vector<8x32xf32>
    %cst_76 = arith.constant 1.250000e+00 : f32
    %238 = vector.broadcast %cst_76 : f32 to vector<8x32xf32>
    %239 = arith.mulf %237, %238 : vector<8x32xf32>
    %240 = arith.mulf %239, %142 : vector<8x32xf32>
    %241 = arith.addf %235, %240 : vector<8x32xf32>
    %cst_77 = arith.constant 2.000000e-01 : f32
    %242 = vector.broadcast %cst_77 : f32 to vector<8x32xf32>
    %243 = arith.subf %0, %242 : vector<8x32xf32>
    %cst_78 = arith.constant 1.250000e+00 : f32
    %244 = vector.broadcast %cst_78 : f32 to vector<8x32xf32>
    %245 = arith.mulf %243, %244 : vector<8x32xf32>
    %246 = arith.mulf %245, %142 : vector<8x32xf32>
    %cst_79 = arith.constant 1.400000e+00 : f32
    %247 = vector.broadcast %cst_79 : f32 to vector<8x32xf32>
    %248 = arith.subf %247, %0 : vector<8x32xf32>
    %cst_80 = arith.constant 1.250000e+00 : f32
    %249 = vector.broadcast %cst_80 : f32 to vector<8x32xf32>
    %250 = arith.mulf %248, %249 : vector<8x32xf32>
    %251 = arith.mulf %250, %153 : vector<8x32xf32>
    %252 = arith.addf %246, %251 : vector<8x32xf32>
    %cst_81 = arith.constant 6.000000e-01 : f32
    %253 = vector.broadcast %cst_81 : f32 to vector<8x32xf32>
    %254 = arith.subf %0, %253 : vector<8x32xf32>
    %cst_82 = arith.constant 1.250000e+00 : f32
    %255 = vector.broadcast %cst_82 : f32 to vector<8x32xf32>
    %256 = arith.mulf %254, %255 : vector<8x32xf32>
    %257 = arith.mulf %256, %153 : vector<8x32xf32>
    %cst_83 = arith.constant 1.800000e+00 : f32
    %258 = vector.broadcast %cst_83 : f32 to vector<8x32xf32>
    %259 = arith.subf %258, %0 : vector<8x32xf32>
    %cst_84 = arith.constant 1.250000e+00 : f32
    %260 = vector.broadcast %cst_84 : f32 to vector<8x32xf32>
    %261 = arith.mulf %259, %260 : vector<8x32xf32>
    %262 = arith.mulf %261, %164 : vector<8x32xf32>
    %263 = arith.addf %257, %262 : vector<8x32xf32>
    %cst_85 = arith.constant 1.000000e+00 : f32
    %264 = vector.broadcast %cst_85 : f32 to vector<8x32xf32>
    %265 = arith.subf %0, %264 : vector<8x32xf32>
    %cst_86 = arith.constant 1.250000e+00 : f32
    %266 = vector.broadcast %cst_86 : f32 to vector<8x32xf32>
    %267 = arith.mulf %265, %266 : vector<8x32xf32>
    %268 = arith.mulf %267, %164 : vector<8x32xf32>
    %cst_87 = arith.constant 2.200000e+00 : f32
    %269 = vector.broadcast %cst_87 : f32 to vector<8x32xf32>
    %270 = arith.subf %269, %0 : vector<8x32xf32>
    %cst_88 = arith.constant 1.250000e+00 : f32
    %271 = vector.broadcast %cst_88 : f32 to vector<8x32xf32>
    %272 = arith.mulf %270, %271 : vector<8x32xf32>
    %273 = arith.mulf %272, %175 : vector<8x32xf32>
    %274 = arith.addf %268, %273 : vector<8x32xf32>
    %cst_89 = arith.constant -2.200000e+00 : f32
    %275 = vector.broadcast %cst_89 : f32 to vector<8x32xf32>
    %276 = arith.subf %0, %275 : vector<8x32xf32>
    %cst_90 = arith.constant 0.833333313 : f32
    %277 = vector.broadcast %cst_90 : f32 to vector<8x32xf32>
    %278 = arith.mulf %276, %277 : vector<8x32xf32>
    %279 = arith.mulf %278, %186 : vector<8x32xf32>
    %cst_91 = arith.constant -6.000000e-01 : f32
    %280 = vector.broadcast %cst_91 : f32 to vector<8x32xf32>
    %281 = arith.subf %280, %0 : vector<8x32xf32>
    %cst_92 = arith.constant 0.833333313 : f32
    %282 = vector.broadcast %cst_92 : f32 to vector<8x32xf32>
    %283 = arith.mulf %281, %282 : vector<8x32xf32>
    %284 = arith.mulf %283, %197 : vector<8x32xf32>
    %285 = arith.addf %279, %284 : vector<8x32xf32>
    %cst_93 = arith.constant -1.800000e+00 : f32
    %286 = vector.broadcast %cst_93 : f32 to vector<8x32xf32>
    %287 = arith.subf %0, %286 : vector<8x32xf32>
    %cst_94 = arith.constant 0.833333313 : f32
    %288 = vector.broadcast %cst_94 : f32 to vector<8x32xf32>
    %289 = arith.mulf %287, %288 : vector<8x32xf32>
    %290 = arith.mulf %289, %197 : vector<8x32xf32>
    %cst_95 = arith.constant -2.000000e-01 : f32
    %291 = vector.broadcast %cst_95 : f32 to vector<8x32xf32>
    %292 = arith.subf %291, %0 : vector<8x32xf32>
    %cst_96 = arith.constant 0.833333313 : f32
    %293 = vector.broadcast %cst_96 : f32 to vector<8x32xf32>
    %294 = arith.mulf %292, %293 : vector<8x32xf32>
    %295 = arith.mulf %294, %208 : vector<8x32xf32>
    %296 = arith.addf %290, %295 : vector<8x32xf32>
    %cst_97 = arith.constant -1.400000e+00 : f32
    %297 = vector.broadcast %cst_97 : f32 to vector<8x32xf32>
    %298 = arith.subf %0, %297 : vector<8x32xf32>
    %cst_98 = arith.constant 0.833333313 : f32
    %299 = vector.broadcast %cst_98 : f32 to vector<8x32xf32>
    %300 = arith.mulf %298, %299 : vector<8x32xf32>
    %301 = arith.mulf %300, %208 : vector<8x32xf32>
    %cst_99 = arith.constant 2.000000e-01 : f32
    %302 = vector.broadcast %cst_99 : f32 to vector<8x32xf32>
    %303 = arith.subf %302, %0 : vector<8x32xf32>
    %cst_100 = arith.constant 0.833333313 : f32
    %304 = vector.broadcast %cst_100 : f32 to vector<8x32xf32>
    %305 = arith.mulf %303, %304 : vector<8x32xf32>
    %306 = arith.mulf %305, %219 : vector<8x32xf32>
    %307 = arith.addf %301, %306 : vector<8x32xf32>
    %cst_101 = arith.constant -1.000000e+00 : f32
    %308 = vector.broadcast %cst_101 : f32 to vector<8x32xf32>
    %309 = arith.subf %0, %308 : vector<8x32xf32>
    %cst_102 = arith.constant 0.833333313 : f32
    %310 = vector.broadcast %cst_102 : f32 to vector<8x32xf32>
    %311 = arith.mulf %309, %310 : vector<8x32xf32>
    %312 = arith.mulf %311, %219 : vector<8x32xf32>
    %cst_103 = arith.constant 6.000000e-01 : f32
    %313 = vector.broadcast %cst_103 : f32 to vector<8x32xf32>
    %314 = arith.subf %313, %0 : vector<8x32xf32>
    %cst_104 = arith.constant 0.833333313 : f32
    %315 = vector.broadcast %cst_104 : f32 to vector<8x32xf32>
    %316 = arith.mulf %314, %315 : vector<8x32xf32>
    %317 = arith.mulf %316, %230 : vector<8x32xf32>
    %318 = arith.addf %312, %317 : vector<8x32xf32>
    %cst_105 = arith.constant -6.000000e-01 : f32
    %319 = vector.broadcast %cst_105 : f32 to vector<8x32xf32>
    %320 = arith.subf %0, %319 : vector<8x32xf32>
    %cst_106 = arith.constant 0.833333313 : f32
    %321 = vector.broadcast %cst_106 : f32 to vector<8x32xf32>
    %322 = arith.mulf %320, %321 : vector<8x32xf32>
    %323 = arith.mulf %322, %230 : vector<8x32xf32>
    %cst_107 = arith.constant 1.000000e+00 : f32
    %324 = vector.broadcast %cst_107 : f32 to vector<8x32xf32>
    %325 = arith.subf %324, %0 : vector<8x32xf32>
    %cst_108 = arith.constant 0.833333313 : f32
    %326 = vector.broadcast %cst_108 : f32 to vector<8x32xf32>
    %327 = arith.mulf %325, %326 : vector<8x32xf32>
    %328 = arith.mulf %327, %241 : vector<8x32xf32>
    %329 = arith.addf %323, %328 : vector<8x32xf32>
    %cst_109 = arith.constant -2.000000e-01 : f32
    %330 = vector.broadcast %cst_109 : f32 to vector<8x32xf32>
    %331 = arith.subf %0, %330 : vector<8x32xf32>
    %cst_110 = arith.constant 0.833333313 : f32
    %332 = vector.broadcast %cst_110 : f32 to vector<8x32xf32>
    %333 = arith.mulf %331, %332 : vector<8x32xf32>
    %334 = arith.mulf %333, %241 : vector<8x32xf32>
    %cst_111 = arith.constant 1.400000e+00 : f32
    %335 = vector.broadcast %cst_111 : f32 to vector<8x32xf32>
    %336 = arith.subf %335, %0 : vector<8x32xf32>
    %cst_112 = arith.constant 0.833333313 : f32
    %337 = vector.broadcast %cst_112 : f32 to vector<8x32xf32>
    %338 = arith.mulf %336, %337 : vector<8x32xf32>
    %339 = arith.mulf %338, %252 : vector<8x32xf32>
    %340 = arith.addf %334, %339 : vector<8x32xf32>
    %cst_113 = arith.constant 2.000000e-01 : f32
    %341 = vector.broadcast %cst_113 : f32 to vector<8x32xf32>
    %342 = arith.subf %0, %341 : vector<8x32xf32>
    %cst_114 = arith.constant 0.833333313 : f32
    %343 = vector.broadcast %cst_114 : f32 to vector<8x32xf32>
    %344 = arith.mulf %342, %343 : vector<8x32xf32>
    %345 = arith.mulf %344, %252 : vector<8x32xf32>
    %cst_115 = arith.constant 1.800000e+00 : f32
    %346 = vector.broadcast %cst_115 : f32 to vector<8x32xf32>
    %347 = arith.subf %346, %0 : vector<8x32xf32>
    %cst_116 = arith.constant 0.833333313 : f32
    %348 = vector.broadcast %cst_116 : f32 to vector<8x32xf32>
    %349 = arith.mulf %347, %348 : vector<8x32xf32>
    %350 = arith.mulf %349, %263 : vector<8x32xf32>
    %351 = arith.addf %345, %350 : vector<8x32xf32>
    %cst_117 = arith.constant 6.000000e-01 : f32
    %352 = vector.broadcast %cst_117 : f32 to vector<8x32xf32>
    %353 = arith.subf %0, %352 : vector<8x32xf32>
    %cst_118 = arith.constant 0.833333313 : f32
    %354 = vector.broadcast %cst_118 : f32 to vector<8x32xf32>
    %355 = arith.mulf %353, %354 : vector<8x32xf32>
    %356 = arith.mulf %355, %263 : vector<8x32xf32>
    %cst_119 = arith.constant 2.200000e+00 : f32
    %357 = vector.broadcast %cst_119 : f32 to vector<8x32xf32>
    %358 = arith.subf %357, %0 : vector<8x32xf32>
    %cst_120 = arith.constant 0.833333313 : f32
    %359 = vector.broadcast %cst_120 : f32 to vector<8x32xf32>
    %360 = arith.mulf %358, %359 : vector<8x32xf32>
    %361 = arith.mulf %360, %274 : vector<8x32xf32>
    %362 = arith.addf %356, %361 : vector<8x32xf32>
    %363 = tpu.concatenate %6, %285, %296, %307, %318, %329, %340, %351, %362 in 1 : vector<8x32xf32>, vector<8x32xf32>, vector<8x32xf32>, vector<8x32xf32>, vector<8x32xf32>, vector<8x32xf32>, vector<8x32xf32>, vector<8x32xf32>, vector<8x32xf32> -> vector<8x288xf32>
    %c0_121 = arith.constant 0 : index
    %c0_122 = arith.constant 0 : index
    %364 = vector.load %arg3[%c0_121, %c0_122] : memref<288x128xf32, #tpu.memory_space<vmem>>, vector<288x128xf32>
    %cst_123 = arith.constant dense<0.000000e+00> : vector<8x128xf32>
    %365 = tpu.matmul %363, %364, %cst_123 {dimension_numbers = #tpu.dot_dimension_numbers<[1], [0], [0], [1], [0, 0, 1, 1], [], []>} : vector<8x288xf32>, vector<288x128xf32>, vector<8x128xf32> -> vector<8x128xf32>
    %c0_124 = arith.constant 0 : index
    %c0_125 = arith.constant 0 : index
    %366 = vector.load %arg4[%c0_124, %c0_125] : memref<8x128xf32, #tpu.memory_space<vmem>>, vector<8x128xf32>
    tpu.vector_store %arg4[%c0_124, %c0_125], %365 {strides = array<i32>} : memref<8x128xf32, #tpu.memory_space<vmem>>, vector<8x128xf32>,
    return
  }
  func.func @transform_0(%arg0: i32, %arg1: i32) -> (i32, i32) {
    %c0_i32 = arith.constant 0 : i32
    %c0_i32_0 = arith.constant 0 : i32
    return %arg0, %c0_i32 : i32, i32
  }
  func.func @transform_1(%arg0: i32, %arg1: i32) -> (i32, i32) {
    %c0_i32 = arith.constant 0 : i32
    %c0_i32_0 = arith.constant 0 : i32
    return %c0_i32, %arg1 : i32, i32
  }
  func.func @transform_2(%arg0: i32, %arg1: i32) -> (i32, i32) {
    %c0_i32 = arith.constant 0 : i32
    return %arg0, %arg1 : i32, i32
  }
}

</mosaic_0001>

<bundles_post_ra>
// kernel: tpu_custom_call.1
= control target key start
LH: loop header
LB: loop body
LE: loop exit
PB: predicated region body
PF: predicated region fallthrough
CT: control target
= control target key end

     0   :  { %7 = vsyncpa [#allocation3], 0  ;;  %s841_s0 = inlined_call_operand.hbm [shape: f32[8,32], index: 0, kind: input, shape index: {}]   ;;  %s842_s1 = inlined_call_operand.hbm [shape: f32[288,128], index: 1, kind: input, shape index: {}]   ;;  %s843_s2 = inlined_call_operand.hbm [shape: f32[8,128], index: 2, kind: output, shape index: {}]  }
   0x1   :  { %8 = vsyncpa [#allocation6], 0 }
   0x2   :  { %9 = vsyncpa [#allocation4], 0  ;;  %s647_s9 = smov [#allocation2]   ;;  %s648_s11 = smov [#allocation5]  }
   0x3   :  { %s16_s10 = sshll.u32 %s647_s9, 4  ;;  %s25_s12 = sshll.u32 %s648_s11, 4  ;;  %s17_s10 = int_to_ptr.vmem [resolvable:$true] %s16_s10  ;;  %s26_s12 = int_to_ptr.vmem [resolvable:$true] %s25_s12 }
   0x4   :  { %s589_s13 = scalar_lea.vmem %s17_s10, 128  ;;  %p594_p1 = scmp.lt.s32.totalorder %s17_s10, %s17_s10 }
   0x5   :  { %p590_p0 = scmp.ne.s32.totalorder %s17_s10, %s589_s13  ;;  %p595_p2 = scmp.lt.s32.totalorder %s589_s13, %s589_s13 }
   0x7   :  { %p596_p3 = por %p595_p2, %p594_p1 }
   0x9   :  { %p597_p4 = pnand %p596_p3, %p590_p0 }
   0xb   :  { %600 = shalt.err (!%p597_p4)
}
   0xc   :  { %19 = dma.hbm_to_vmem [thread:$0]  %s841_s0, 128, %s17_s10, [#allocation3]  }
   0xd   :  { %s609_s16 = scalar_lea.vmem %s26_s12, 4608  ;;  %p614_p6 = scmp.lt.s32.totalorder %s26_s12, %s26_s12 }
   0xe   :  { %p610_p5 = scmp.ne.s32.totalorder %s26_s12, %s609_s16  ;;  %p615_p7 = scmp.lt.s32.totalorder %s609_s16, %s609_s16 }
  0x10   :  { %p616_p8 = por %p615_p7, %p614_p6 }
  0x12   :  { %p617_p9 = pnand %p616_p8, %p610_p5 }
  0x14   :  { %620 = shalt.err (!%p617_p9)
}
  0x15   :  { %s649_s17 = smov 128   ;;  %s650_s18 = smov 8  }
  0x16   :  { %31 = dma.hbm_to_vmem [thread:$0]  %s842_s1, 4608, %s26_s12, [#allocation6], %s649_s17, %s649_s17, %s650_s18  }
  0x17   :  { %641 = dma.done.wait [#allocation3], 128  }
  0x18   :  { %642 = vsyncadd [#allocation3], 4294967168 }
  0x19   :  { %643 = dma.done.wait [#allocation6], 4608  }
  0x1a   :  { %644 = vsyncadd [#allocation6], 4294962688  ;;  %v651_v0 = vmov 0.0   ;;  %v679_v1 = vld [vmem:[#allocation2] sm:$0xff]  ;;  %v311_v7 = vld [vmem:[#allocation5 + $0xf0] sm:$0xff]  ;;  %s652_s0 = smov 32  }
  0x1b   :  { %541 = vmatprep.subr.mxu1 %v651_v0  ;;  %v312_v2 = vld [vmem:[#allocation5 + $0xf8] sm:$0xff]  ;;  %vm46_vm0 = vcmp.ge.f32.partialorder %v679_v1, -2.2  ;;  %vm49_vm1 = vcmp.ge.f32.partialorder %v679_v1, -1.8  ;;  %vm55_vm3 = vcmp.ge.f32.partialorder %v679_v1, -1.0 }
  0x1c   :  { %v296_v3 = vld [vmem:[#allocation5 + $0x78] sm:$0xff]  ;;  %vm52_vm2 = vcmp.ge.f32.partialorder %v679_v1, -1.4  ;;  %501 = vmatprep.subr.mxu0 %v312_v2  ;;  %v478_v4 = vsel %vm46_vm0, 1.0, %v651_v0  ;;  %v479_v5 = vsel %vm49_vm1, 1.0, %v651_v0  ;;  %v295_v8 = vld [vmem:[#allocation5 + $0x70] sm:$0xff] }
  0x1d   :  { %v480_v6 = vsel %vm52_vm2, 1.0, %v651_v0  ;;  %502 = vmatpush3.msra.mxu0 %v296_v3  ;;  %v481_v9 = vsel %vm55_vm3, 1.0, %v651_v0  ;;  %vm58_vm4 = vcmp.ge.f32.partialorder %v679_v1, -0.6  ;;  %vm61_vm5 = vcmp.ge.f32.partialorder %v679_v1, -0.2 }
  0x1e   :  { %vm70_vm6 = vcmp.ge.f32.partialorder %v679_v1, 1.0  ;;  %503 = vmatprep.subr.mxu0 %v311_v7  ;;  %v482_v10 = vsel %vm58_vm4, 1.0, %v651_v0  ;;  %v483_v11 = vsel %vm61_vm5, 1.0, %v651_v0  ;;  %vm64_vm7 = vcmp.ge.f32.partialorder %v679_v1, 0.2  ;;  %v310_v15 = vld [vmem:[#allocation5 + $0xe8] sm:$0xff] }
  0x1f   :  { %vm67_vm8 = vcmp.ge.f32.partialorder %v679_v1, 0.6  ;;  %504 = vmatpush3.msra.mxu0 %v295_v8  ;;  %v484_v12 = vsel %vm64_vm7, 1.0, %v651_v0  ;;  %v486_v14 = vsel %vm70_vm6, 1.0, %v651_v0  ;;  %vm73_vm9 = vcmp.ge.f32.partialorder %v679_v1, 1.4 }
  0x20   :  { %v485_v13 = vsel %vm67_vm8, 1.0, %v651_v0  ;;  %v701_v16 = vsel %vm73_vm9, 1.0, %v651_v0  ;;  %v82_v17 = vsub.f32 %v478_v4, %v479_v5  ;;  %v83_v18 = vsub.f32 %v479_v5, %v480_v6  ;;  %505 = vmatprep.subr.mxu0 %v310_v15  ;;  %v294_v20 = vld [vmem:[#allocation5 + $0x68] sm:$0xff]  ;;  %v309_v21 = vld [vmem:[#allocation5 + $0xe0] sm:$0xff]  ;;  %v308_v27 = vld [vmem:[#allocation5 + $0xd8] sm:$0xff]  ;;  %s653_s1 = smov 64  }
  0x21   :  { %v84_v19 = vsub.f32 %v480_v6, %v481_v9  ;;  %v293_v22 = vld [vmem:[#allocation5 + $0x60] sm:$0xff]  ;;  %v703_v23 = vsub.f32 %v481_v9, %v482_v10  ;;  %v705_v24 = vsub.f32 %v482_v10, %v483_v11  ;;  %v707_v25 = vsub.f32 %v483_v11, %v484_v12  ;;  %506 = vmatpush3.msra.mxu0 %v294_v20  ;;  %v292_v28 = vld [vmem:[#allocation5 + $0x58] sm:$0xff]  ;;  %v307_v33 = vld [vmem:[#allocation5 + $0xd0] sm:$0xff]  ;;  %s655_s21 = smov 96   ;;  %s656_s22 = smov [#allocation7]  }
  0x22   :  { %v709_v26 = vsub.f32 %v484_v12, %v485_v13  ;;  %v711_v29 = vsub.f32 %v485_v13, %v486_v14  ;;  %v714_v30 = vsub.f32 %v486_v14, %v701_v16  ;;  %v717_v31 = vadd.f32 2.2, %v679_v1  ;;  %507 = vmatprep.subr.mxu0 %v309_v21  ;;  %v291_v34 = vld [vmem:[#allocation5 + $0x50] sm:$0xff]  ;;  %v306_v47 = vld [vmem:[#allocation5 + $0xc8] sm:$0xff]  ;;  %v305_v57 = vld [vmem:[#allocation5 + $0xc0] sm:$0xff]  ;;  %s467_s23 = sshll.u32 %s656_s22, 4  ;;  %s468_s23 = int_to_ptr.vmem [resolvable:$true] %s467_s23 }
  0x23   :  { %v96_v32 = vsub.f32 -1.4, %v679_v1  ;;  %v721_v35 = vadd.f32 1.8, %v679_v1  ;;  %v103_v36 = vsub.f32 -1.0, %v679_v1  ;;  %v728_v38 = vsub.f32 1.0, %v679_v1  ;;  %508 = vmatpush3.msra.mxu0 %v293_v22  ;;  %p626_p11 = scmp.lt.s32.totalorder %s468_s23, %s468_s23 }
  0x24   :  { %v725_v37 = vadd.f32 1.4, %v679_v1  ;;  %v94_v39 = vmul.f32 2.5, %v717_v31  ;;  %v732_v41 = vsub.f32 -0.6, %v679_v1  ;;  %509 = vmatprep.subr.mxu0 %v308_v27  ;;  %v290_v52 = vld [vmem:[#allocation5 + $0x48] sm:$0xff] }
  0x25   :  { %v97_v40 = vmul.f32 2.5, %v96_v32  ;;  %v735_v42 = vadd.f32 0.6, %v679_v1  ;;  %v101_v43 = vmul.f32 2.5, %v721_v35  ;;  %v104_v44 = vmul.f32 2.5, %v103_v36  ;;  %510 = vmatpush3.msra.mxu0 %v292_v28  ;;  %v289_v62 = vld [vmem:[#allocation5 + $0x40] sm:$0xff] }
  0x26   :  { %v108_v45 = vmul.f32 2.5, %v725_v37  ;;  %v740_v46 = vsub.f32 0.2, %v679_v1  ;;  %v95_v48 = vmul.f32 %v94_v39, %v82_v17  ;;  %v111_v50 = vmul.f32 2.5, %v732_v41  ;;  %511 = vmatprep.subr.mxu0 %v307_v33  ;;  %v304_v5 = vld [vmem:[#allocation5 + $0xb8] sm:$0xff]  ;;  %v303_v15 = vld [vmem:[#allocation5 + $0xb0] sm:$0xff] }
  0x27   :  { %v98_v49 = vmul.f32 %v97_v40, %v83_v18  ;;  %v122_v51 = vmul.f32 2.5, %v735_v42  ;;  %v102_v53 = vmul.f32 %v101_v43, %v83_v18  ;;  %v105_v54 = vmul.f32 %v104_v44, %v84_v19  ;;  %512 = vmatpush3.msra.mxu0 %v291_v34  ;;  %v288_v10 = vld [vmem:[#allocation5 + $0x38] sm:$0xff]  ;;  %v287_v21 = vld [vmem:[#allocation5 + $0x30] sm:$0xff]  ;;  %v302_v33 = vld [vmem:[#allocation5 + $0xa8] sm:$0xff]  ;;  %s621_s24 = scalar_lea.vmem %s468_s23, 128 }
  0x28   :  { %v109_v55 = vmul.f32 %v108_v45, %v84_v19  ;;  %v125_v56 = vmul.f32 2.5, %v740_v46  ;;  %v112_v59 = vmul.f32 %v111_v50, %v703_v23  ;;  %v748_v61 = vadd.f32 0.2, %v679_v1  ;;  %513 = vmatprep.subr.mxu0 %v306_v47  ;;  %v286_v40 = vld [vmem:[#allocation5 + $0x28] sm:$0xff]  ;;  %p622_p10 = scmp.ne.s32.totalorder %s468_s23, %s621_s24  ;;  %p627_p12 = scmp.lt.s32.totalorder %s621_s24, %s621_s24 }
  0x29   :  { %v99_v58 = vadd.f32 %v98_v49, %v95_v48  ;;  %v123_v60 = vmul.f32 %v122_v51, %v705_v24  ;;  %v106_v63 = vadd.f32 %v105_v54, %v102_v53  ;;  %v131_v3 = vsub.f32 0.6, %v679_v1  ;;  %514 = vmatpush3.msra.mxu0 %v290_v52  ;;  %v285_v52 = vld [vmem:[#allocation5 + $0x20] sm:$0xff] }
  0x2a   :  { %v126_v2 = vmul.f32 %v125_v56, %v707_v25  ;;  %v753_v4 = vadd.f32 -0.2, %v679_v1  ;;  %v755_v6 = vadd.f32 %v112_v59, %v109_v55  ;;  %v129_v7 = vmul.f32 2.5, %v748_v61  ;;  %515 = vmatprep.subr.mxu0 %v305_v57  ;;  %v300_v57 = vld [vmem:[#allocation5 + $0x98] sm:$0xff]  ;;  %p628_p13 = por %p627_p12, %p626_p11 }
  0x2b   :  { %v139_v8 = vmul.f32 2.5, %v728_v38  ;;  %v163_v9 = vmul.f32 1.25, %v717_v31  ;;  %v132_v12 = vmul.f32 2.5, %v131_v3  ;;  %v165_v14 = vmul.f32 1.25, %v103_v36  ;;  %516 = vmatpush3.msra.mxu0 %v289_v62 }
  0x2c   :  { %v760_v11 = vadd.f32 %v126_v2, %v123_v60  ;;  %v136_v13 = vmul.f32 2.5, %v753_v4  ;;  %v130_v17 = vmul.f32 %v129_v7, %v707_v25  ;;  %v168_v20 = vmul.f32 1.25, %v721_v35  ;;  %517 = vmatprep.subr.mxu0 %v304_v5  ;;  %v299_v7 = vld [vmem:[#allocation5 + $0x90] sm:$0xff]  ;;  %p629_p0 = pnand %p628_p13, %p622_p10 }
  0x2d   :  { %v140_v18 = vmul.f32 %v139_v8, %v711_v29  ;;  %v164_v19 = vmul.f32 %v163_v9, %v99_v58  ;;  %v133_v22 = vmul.f32 %v132_v12, %v709_v26  ;;  %v166_v28 = vmul.f32 %v165_v14, %v106_v63  ;;  %518 = vmatpush3.msra.mxu0 %v288_v10 }
  0x2e   :  { %v137_v27 = vmul.f32 %v136_v13, %v709_v26  ;;  %v170_v32 = vmul.f32 1.25, %v732_v41  ;;  %v169_v34 = vmul.f32 %v168_v20, %v106_v63  ;;  %v183_v36 = vmul.f32 1.25, %v735_v42  ;;  %519 = vmatprep.subr.mxu0 %v303_v15  ;;  %v301_v26 = vld [vmem:[#allocation5 + $0xa0] sm:$0xff]  ;;  %v284_v63 = vld [vmem:[#allocation5 + $0x18] sm:$0xff] }
  0x2f   :  { %v185_v25 = vmul.f32 1.25, %v131_v3  ;;  %v188_v39 = vmul.f32 1.25, %v748_v61  ;;  %v134_v43 = vadd.f32 %v133_v22, %v130_v17  ;;  %v167_v45 = vadd.f32 %v166_v28, %v164_v19  ;;  %520 = vmatpush3.msra.mxu0 %v287_v21 }
  0x30   :  { %v141_v44 = vadd.f32 %v140_v18, %v137_v27  ;;  %v171_v47 = vmul.f32 %v170_v32, %v755_v6  ;;  %v184_v48 = vmul.f32 %v183_v36, %v760_v11  ;;  %v190_v49 = vmul.f32 1.25, %v728_v38  ;;  %521 = vmatprep.subr.mxu0 %v302_v33 }
  0x31   :  { %v208_v50 = vmul.f32 0.8333333, %v717_v31  ;;  %v210_v51 = vmul.f32 0.8333333, %v732_v41  ;;  %v186_v54 = vmul.f32 %v185_v25, %v134_v43  ;;  %v189_v55 = vmul.f32 %v188_v39, %v134_v43  ;;  %522 = vmatpush3.msra.mxu0 %v286_v40  ;;  %v283_v39 = vld [vmem:[#allocation5 + $0x10] sm:$0xff] }
  0x32   :  { %v172_v53 = vadd.f32 %v171_v47, %v169_v34  ;;  %v225_v56 = vmul.f32 0.8333333, %v131_v3  ;;  %v191_v58 = vmul.f32 %v190_v49, %v141_v44  ;;  %v228_v60 = vmul.f32 0.8333333, %v735_v42  ;;  %523 = vmatprep.subr.mxu0 %v301_v26  ;;  %v316_v47 = vld [vmem:[#allocation5 + $0x118] sm:$0xff] }
  0x33   :  { %v209_v59 = vmul.f32 %v208_v50, %v167_v45  ;;  %v230_v62 = vmul.f32 0.8333333, %v728_v38  ;;  %v187_v2 = vadd.f32 %v186_v54, %v184_v48  ;;  %v779_v41 = vadd.f32 1.0, %v679_v1  ;;  %524 = vmatpush3.msra.mxu0 %v285_v52  ;;  %542 = vmatpush3.msra.mxu1 %v316_v47 }
  0x34   :  { %v211_v31 = vmul.f32 %v210_v51, %v172_v53  ;;  %v117_v5 = vsub.f32 -0.2, %v679_v1  ;;  %v192_v3 = vadd.f32 %v191_v58, %v189_v55  ;;  %v783_v8 = vadd.f32 -0.6, %v679_v1  ;;  %525 = vmatprep.subr.mxu0 %v300_v57  ;;  %543 = vmatprep.subr.mxu1 %v651_v0 }
  0x35   :  { %v145_v9 = vsub.f32 1.4, %v679_v1  ;;  %v173_v42 = vmul.f32 1.25, %v725_v37  ;;  %v787_v10 = vmul.f32 %v225_v56, %v187_v2  ;;  %v229_v12 = vmul.f32 %v228_v60, %v187_v2  ;;  %526 = vmatpush3.msra.mxu0 %v284_v63 }
  0x36   :  { %v212_v38 = vadd.f32 %v211_v31, %v209_v59  ;;  %v115_v13 = vmul.f32 2.5, %v779_v41  ;;  %v231_v14 = vmul.f32 %v230_v62, %v192_v3  ;;  %v118_v15 = vmul.f32 2.5, %v117_v5  ;;  %527 = vmatprep.subr.mxu0 %v299_v7 }
  0x37   :  { %v143_v17 = vmul.f32 2.5, %v783_v8  ;;  %v146_v18 = vmul.f32 2.5, %v145_v9  ;;  %v175_v20 = vmul.f32 1.25, %v117_v5  ;;  %v193_v21 = vmul.f32 1.25, %v753_v4  ;;  %528 = vmatpush3.msra.mxu0 %v283_v39 }
  0x38   :  { %v116_v19 = vmul.f32 %v115_v13, %v703_v23  ;;  %v232_v22 = vadd.f32 %v231_v14, %v229_v12  ;;  %v119_v27 = vmul.f32 %v118_v15, %v705_v24  ;;  %v174_v33 = vmul.f32 %v173_v42, %v755_v6  ;;  %v315_v12 = vld [vmem:[#allocation5 + $0x110] sm:$0xff] }
  0x39   :  { %v144_v28 = vmul.f32 %v143_v17, %v711_v29  ;;  %v147_v32 = vmul.f32 %v146_v18, %v714_v30  ;;  %v194_v34 = vmul.f32 %v193_v21, %v141_v44  ;;  %v195_v36 = vmul.f32 1.25, %v145_v9  ;;  %544 = vmatpush3.msra.mxu1 %v315_v12  ;;  %v281_v17 = vld [vmem:[#allocation5] sm:$0xff] }
  0x3a   :  { %v213_v25 = vmul.f32 0.8333333, %v721_v35  ;;  %v562_v40 = vpack.i.bf16 %v212_v38, %v232_v22  ;;  %v120_v43 = vadd.f32 %v119_v27, %v116_v19  ;;  %v233_v45 = vmul.f32 0.8333333, %v748_v61  ;;  %v282_v38 = vld [vmem:[#allocation5 + $0x8] sm:$0xff]  ;;  %545 = vmatprep.subr.mxu1 %v651_v0 }
  0x3b   :  { %v148_v23 = vadd.f32 %v147_v32, %v144_v28  ;;  %v215_v24 = vmul.f32 0.8333333, %v117_v5  ;;  %vm76_vm10 = vcmp.ge.f32.partialorder %v679_v1, 1.8  ;;  %v235_v44 = vmul.f32 0.8333333, %v145_v9 }
  0x3c   :  { %v214_v26 = vmul.f32 %v213_v25, %v172_v53  ;;  %563 = vrot.lane.b32.xlu0 %v562_v40, %s652_s0  ;;  %v176_v29 = vmul.f32 %v175_v20, %v120_v43  ;;  %v801_v35 = vsel %vm76_vm10, 1.0, %v651_v0  ;;  %vm79_vm11 = vcmp.ge.f32.partialorder %v679_v1, 2.2  ;;  %v298_v5 = vld [vmem:[#allocation5 + $0x88] sm:$0xff] }
  0x3d   :  { %v196_v6 = vmul.f32 %v195_v36, %v148_v23  ;;  %v807_v61 = vsub.f32 %v701_v16, %v801_v35  ;;  %v498_v48 = vadd.f32 -1.0, %v679_v1  ;;  %v152_v49 = vsub.f32 1.8, %v679_v1  ;;  %529 = vmatprep.subr.mxu0 %v298_v5 }
  0x3e   :  { %v177_v50 = vadd.f32 %v176_v29, %v174_v33  ;;  %v234_v52 = vmul.f32 %v233_v45, %v192_v3  ;;  %v178_v53 = vmul.f32 1.25, %v779_v41  ;;  %v180_v56 = vmul.f32 1.25, %v740_v46  ;;  %530 = vmatpush3.msra.mxu0 %v282_v38 }
  0x3f   :  { %v197_v51 = vadd.f32 %v196_v6, %v194_v34  ;;  %v150_v54 = vmul.f32 2.5, %v498_v48  ;;  %v153_v55 = vmul.f32 2.5, %v152_v49  ;;  %v198_v57 = vmul.f32 1.25, %v783_v8 }
  0x40   :  { %v216_v58 = vmul.f32 %v215_v24, %v177_v50  ;;  %v179_v60 = vmul.f32 %v178_v53, %v120_v43  ;;  %v200_v16 = vmul.f32 1.25, %v152_v49  ;;  %v181_v2 = vmul.f32 %v180_v56, %v760_v11  ;;  %v297_v11 = vld [vmem:[#allocation5 + $0x80] sm:$0xff] }
  0x41   :  { %v236_v59 = vmul.f32 %v235_v44, %v197_v51  ;;  %v151_v62 = vmul.f32 %v150_v54, %v714_v30  ;;  %v154_v63 = vmul.f32 %v153_v55, %v807_v61  ;;  %v199_v31 = vmul.f32 %v198_v57, %v148_v23  ;;  %531 = vmatprep.subr.mxu0 %v297_v11 }
  0x42   :  { %v217_v7 = vadd.f32 %v216_v58, %v214_v26  ;;  %v218_v9 = vmul.f32 0.8333333, %v725_v37  ;;  %v220_v42 = vmul.f32 0.8333333, %v740_v46  ;;  %v182_v14 = vadd.f32 %v181_v2, %v179_v60  ;;  %v314_v46 = vld [vmem:[#allocation5 + $0x108] sm:$0xff]  ;;  %532 = vmatpush3.msra.mxu0 %v281_v17 }
  0x43   :  { %v237_v3 = vadd.f32 %v236_v59, %v234_v52  ;;  %v155_v13 = vadd.f32 %v154_v63, %v151_v62  ;;  %v223_v15 = vmul.f32 0.8333333, %v779_v41  ;;  %v238_v30 = vmul.f32 0.8333333, %v753_v4  ;;  %546 = vmatpush3.msra.mxu1 %v314_v46  ;;  %v313_v4 = vld [vmem:[#allocation5 + $0x100] sm:$0xff] }
  0x44   :  { %v489_v37 = vsel %vm79_vm11, 1.0, %v651_v0  ;;  %v219_v19 = vmul.f32 %v218_v9, %v177_v50  ;;  %v221_v21 = vmul.f32 %v220_v42, %v182_v14  ;;  %v240_v41 = vmul.f32 0.8333333, %v152_v49  ;;  %547 = vmatprep.subr.mxu1 %v651_v0 }
  0x45   :  { %v567_v18 = vpack.i.bf16 %v217_v7, %v237_v3  ;;  %v201_v20 = vmul.f32 %v200_v16, %v155_v13  ;;  %v224_v22 = vmul.f32 %v223_v15, %v182_v14  ;;  %v239_v28 = vmul.f32 %v238_v30, %v197_v51  ;;  %548 = vmatpush3.msra.mxu1 %v313_v4 }
  0x46   :  { %vm654_vm12 = vmmov 0   ;;  %v499_v33 = vadd.f32 -1.4, %v679_v1  ;;  %v92_v34 = vsub.f32 %v801_v35, %v489_v37  ;;  %v159_v36 = vsub.f32 2.2, %v679_v1 }
  0x47   :  { %568 = vrot.lane.b32.xlu0 %v567_v18, %s653_s1  ;;  %v202_v27 = vadd.f32 %v201_v20, %v199_v31  ;;  %v227_v32 = vadd.f32 %v787_v10, %v224_v22  ;;  %549 = vmatprep.mubr.msk.f32.mxu1 %vm654_vm12, %v651_v0  ;;  %v222_v25 = vadd.f32 %v221_v21, %v219_v19  ;;  %v203_v23 = vmul.f32 1.25, %v498_v48 }
  0x48   :  { %v157_v40 = vmul.f32 2.5, %v499_v33  ;;  %v160_v43 = vmul.f32 2.5, %v159_v36  ;;  %v205_v26 = vmul.f32 1.25, %v159_v36  ;;  %v243_v6 = vmul.f32 0.8333333, %v783_v8 }
  0x49   :  { %v241_v39 = vmul.f32 %v240_v41, %v202_v27  ;;  %v204_v0 = vmul.f32 %v203_v23, %v155_v13  ;;  %v245_v35 = vmul.f32 0.8333333, %v159_v36  ;;  %vm272_vm13 = vcmask 261120  }
  0x4a   :  { %v158_v10 = vmul.f32 %v157_v40, %v807_v61  ;;  %v161_v47 = vmul.f32 %v160_v43, %v92_v34  ;;  %v244_v50 = vmul.f32 %v243_v6, %v202_v27  ;;  %v477_v61 = vmul.f32 -1.442695, %v679_v1 }
  0x4b   :  { %v242_v45 = vadd.f32 %v241_v39, %v239_v28  ;;  %vm274_vm14 = vcmask 523264   ;;  %vm276_vm15 = vcmask 785408  }
  0x4c   :  { %v162_v29 = vadd.f32 %v161_v47, %v158_v10  ;;  %577 = vpow2.f32 %v477_v61 }
  0x4d   :  { %v572_v24 = vpack.i.bf16 %v222_v25, %v242_v45 }
  0x4e   :  { %v206_v44 = vmul.f32 %v205_v26, %v162_v29 }
  0x4f   :  { %573 = vrot.lane.b32.xlu1 %v572_v24, %s655_s21 }
  0x50   :  { %v207_v49 = vadd.f32 %v206_v44, %v204_v0 }
  0x52   :  { %v246_v51 = vmul.f32 %v245_v35, %v207_v49 }
  0x54   :  { %v247_v52 = vadd.f32 %v246_v51, %v244_v50 }
  0x56   :  { %550 = vmatmul.mubr.msk.f32.vlgmr.msra.gmra.mxu1 %vm272_vm13, %v247_v52 }
  0x59   :  { %v578_v48 = vpop.eup %577 }
  0x5a   :  { %v42_v53 = vadd.f32 1.0, %v578_v48 }
  0x5c   :  { %579 = vrcp.f32 %v42_v53 }
  0x69   :  { %v580_v55 = vpop.eup %579 }
  0x6a   :  { %v45_v58 = vmul.f32 %v580_v55, %v679_v1 }
  0xae   :  { %v564_v54 = vpop.permute.xlu0 %563 }
  0xaf   :  { %v566_v56 = vunpack.i.h.bf16 %v564_v54  ;;  %v565_v57 = vunpack.i.l.bf16 %v564_v54 }
  0xb1   :  { %v278_v16 = vsel %vm272_vm13, %v227_v32, %v565_v57  ;;  %v273_v62 = vsel %vm272_vm13, %v45_v58, %v566_v56 }
  0xb9   :  { %v569_v8 = vpop.permute.xlu0 %568 }
  0xba   :  { %v571_v59 = vunpack.i.h.bf16 %v569_v8  ;;  %v570_v60 = vunpack.i.l.bf16 %v569_v8 }
  0xbc   :  { %v279_v2 = vsel %vm274_vm14, %v278_v16, %v570_v60  ;;  %v275_v31 = vsel %vm274_vm14, %v273_v62, %v571_v59 }
  0xc1   :  { %v574_v63 = vpop.permute.xlu1 %573 }
  0xc2   :  { %v576_v5 = vunpack.i.h.bf16 %v574_v63  ;;  %v575_v7 = vunpack.i.l.bf16 %v574_v63 }
  0xc4   :  { %v280_v3 = vsel %vm276_vm15, %v279_v2, %v575_v7  ;;  %v277_v9 = vsel %vm276_vm15, %v275_v31, %v576_v5 }
  0xc5   :  { %384 = vmatprep.mubr.f32.mxu0 %v280_v3 }
  0xc6   :  { %385 = vmatmul.mubr.f32.vlgmr.msra.gmra.mxu0 %v277_v9 }
 0x116   :  { %v456_v42 = vpop.f32.mrf.mxu1 }
 0x118   :  { %v551_v38 = vpop.f32.mrf.mxu1 }
 0x186   :  { %v533_v1 = vpop.f32.mrf.mxu0 }
 0x188   :  { %v534_v12 = vpop.f32.mrf.mxu0 }
 0x189   :  { %v535_v13 = vadd.f32 %v534_v12, %v533_v1 }
 0x18b   :  { %v457_v14 = vadd.f32 %v535_v13, %v456_v42 }
 0x18d   :  { %460 = vst [vmem:[#allocation7] sm:$0xff] %v457_v14 }
 0x18e   :  { %632 = shalt.err (!%p629_p0)
}
 0x18f   :  { %470 = dma.vmem_to_hbm [thread:$0]  %s468_s23, 128, %s843_s2, [#allocation4]  }
 0x190   :  { %645 = dma.done.wait [#allocation4], 128  }
 0x191   :  { %646 = vsyncadd [#allocation4], 4294967168 }
 0x192   :  { %474 = vsyncpa [#allocation3], 1 }
 0x193   :  { %475 = vsyncpa [#allocation6], 1 }
 0x194   :  { %476 = vsyncpa [#allocation4], 1 }

</bundles_post_ra>
